<compile_context>
chip_gen: v7x
topology: tpu7x:2x2x1
jax: 0.10.0
libtpu: 0.0.40
codegen_flags: <defaults>
</compile_context>

<pallas_src>
import functools

import jax
import jax.numpy as jnp
from jax import lax
from jax.experimental import pallas as pl
from jax.experimental.pallas import tpu as pltpu

BN_EPS = 1e-5
# bf16 MXU operands (native MXU rate on v5e/v6e/v7x); accumulation stays f32.
MATMUL_DTYPE = jnp.bfloat16


def _down_kernel(x_ref, mask_ref, w1_ref, b1_ref, g1_ref, be1_ref,
                 w2_ref, b2_ref, g2_ref, be2_ref, out_ref,
                 *, wp2, n_interior):
    # x_ref   : [2, 2, Cin, L]  2x2 pool-window offsets split out; the input
    #           was pre-padded spatially by 2, so the in-kernel pooling max
    #           directly yields the pooled map WITH its 1-px zero halo.
    # mask_ref: [1, L] f32, 1.0 at interior (real) pixels, 0.0 on halo / pad.
    # w*_ref  : [9, Co, Ci] bf16 per-tap conv weights (tap t = ky*3 + kx).
    # b/g/be  : [C, 1] f32 per-channel columns.
    # out_ref : [Cout, L] f32 lane-dense output (wrapper extracts interior).
    L = x_ref.shape[-1]
    mask = mask_ref[...]
    inv_p = 1.0 / float(n_interior)

    # ---- MaxPool2d(2): elementwise max over the four window offsets --------
    x = x_ref[...]
    pooled = jnp.maximum(jnp.maximum(x[0, 0], x[0, 1]),
                         jnp.maximum(x[1, 0], x[1, 1]))        # [Cin, L] f32

    def conv3x3(act, w_ref_, b_col):
        # 9 tap-accumulated MXU matmuls on the lane-dense padded pixel grid.
        # Tap (ky,kx) reads pixel p + (ky-1)*wp2 + (kx-1) == lane roll by -s;
        # roll wrap / cross-row leakage only lands on masked halo pixels.
        acc = None
        for ky in range(3):
            for kx in range(3):
                s = (ky - 1) * wp2 + (kx - 1)
                tap = act if s == 0 else pltpu.roll(act, (-s) % L, axis=1)
                d = jnp.dot(w_ref_[ky * 3 + kx], tap.astype(MATMUL_DTYPE),
                            preferred_element_type=jnp.float32)
                acc = d if acc is None else acc + d
        return acc + b_col

    def bn_relu(h, g_col, be_col):
        # BatchNorm2d (training-mode batch stats) in one masked sweep.
        hm = h * mask
        s1 = jnp.sum(hm, axis=1, keepdims=True)                # [C, 1]
        s2 = jnp.sum(hm * hm, axis=1, keepdims=True)           # [C, 1]
        mean = s1 * inv_p
        var = s2 * inv_p - mean * mean
        y = (h - mean) * (lax.rsqrt(var + BN_EPS) * g_col) + be_col
        return jnp.maximum(y, 0.0) * mask      # halo forced back to exact 0

    h1 = bn_relu(conv3x3(pooled, w1_ref, b1_ref[...]),
                 g1_ref[...], be1_ref[...])                    # [Cmid, L]
    h2 = bn_relu(conv3x3(h1, w2_ref, b2_ref[...]),
                 g2_ref[...], be2_ref[...])                    # [Cout, L]
    out_ref[...] = h2                                          # lane-dense store
    # TODO(synk): BatchNorm running_mean / running_var buffer updates (training
    # side effect, not part of the forward output) are not modeled.


def down_pallas(x_nchw, params):
    N, Cin, H, W = x_nchw.shape
    assert H % 2 == 0 and W % 2 == 0, "MaxPool2d(2) + pre-pad trick need even H, W"
    H2, W2 = H // 2, W // 2
    Hp2, Wp2 = H2 + 2, W2 + 2
    Cmid = params["w1"].shape[0]
    Cout = params["w2"].shape[0]
    Pp = N * Hp2 * Wp2                       # padded pixel count
    L = ((Pp + 127) // 128) * 128            # round up to full lane tiles
    n_interior = N * H2 * W2                 # BatchNorm reduction count

    x = x_nchw.astype(jnp.float32)
    # Pre-pad by 2 so 2x2 max-pooling of the padded tensor directly yields the
    # pooled map with the 1-px zero halo conv1 needs (pad width 2 is a
    # multiple of the pool stride -> halo windows lie entirely in the zeros).
    xp = jnp.pad(x, ((0, 0), (0, 0), (2, 2), (2, 2)))
    xs = xp.reshape(N, Cin, Hp2, 2, Wp2, 2).transpose(3, 5, 1, 0, 2, 4)
    x_split = xs.reshape(2, 2, Cin, Pp)
    x_split = jnp.pad(x_split, ((0, 0), (0, 0), (0, 0), (0, L - Pp)))

    # Interior-pixel mask: 1 inside the H2 x W2 image, 0 on halo / lane pad.
    ym = (jnp.arange(Hp2) >= 1) & (jnp.arange(Hp2) <= H2)
    xm = (jnp.arange(Wp2) >= 1) & (jnp.arange(Wp2) <= W2)
    m2d = (ym[:, None] & xm[None, :]).astype(jnp.float32)      # [Hp2, Wp2]
    mask = jnp.broadcast_to(m2d[None], (N, Hp2, Wp2)).reshape(1, Pp)
    mask = jnp.pad(mask, ((0, 0), (0, L - Pp)))

    # Conv weights OIHW -> [9 taps, Co, Ci] (tap t = ky*3 + kx), bf16 operands.
    w1t = jnp.transpose(params["w1"], (2, 3, 0, 1)).reshape(9, Cmid, Cin).astype(MATMUL_DTYPE)
    w2t = jnp.transpose(params["w2"], (2, 3, 0, 1)).reshape(9, Cout, Cmid).astype(MATMUL_DTYPE)
    col = lambda v: v.astype(jnp.float32).reshape(-1, 1)       # per-channel columns

    vmem = pl.BlockSpec(memory_space=pltpu.MemorySpace.VMEM)
    kernel = functools.partial(_down_kernel, wp2=Wp2, n_interior=n_interior)
    out2d = pl.pallas_call(
        kernel,
        out_shape=jax.ShapeDtypeStruct((Cout, L), jnp.float32),
        in_specs=[vmem] * 10,
        out_specs=vmem,
        # 32 MiB stays inside every generation's scoped budget (v7x physical
        # VMEM is only 64 MiB); raise toward ~64-100 MiB on v5e/v6e only when
        # row-band tiles grow at production sizes.
        compiler_params=pltpu.CompilerParams(vmem_limit_bytes=32 * 1024 * 1024),
    )(x_split, mask,
      w1t, col(params["b1"]), col(params["g1"]), col(params["be1"]),
      w2t, col(params["b2"]), col(params["g2"]), col(params["be2"]))

    # [Cout, L] lane-dense -> NCHW to match the PyTorch module's output layout.
    # TODO(synk): in a full UNet, keep the lane-dense [C, pixels] convention
    # between layers so these wrapper transposes cancel across the network.
    out = out2d[:, :Pp].reshape(Cout, N, Hp2, Wp2)[:, :, 1:H2 + 1, 1:W2 + 1]
    return out.transpose(1, 0, 2, 3)


def down_reference(x, p, conv_dtype=jnp.float32):
    """Pure-JAX NCHW reference mirroring the PyTorch forward.

    conv_dtype=bfloat16 mirrors the kernel's bf16 MXU operands (f32 accum).
    """
    pooled = lax.reduce_window(x, -jnp.inf, lax.max,
                               (1, 1, 2, 2), (1, 1, 2, 2), "VALID")

    def conv_bn_relu(h, w, b, g, be):
        hc = lax.conv_general_dilated(
            h.astype(conv_dtype), w.astype(conv_dtype), (1, 1), "SAME",
            dimension_numbers=("NCHW", "OIHW", "NCHW"),
            preferred_element_type=jnp.float32)
        hc = hc + b[None, :, None, None]
        mean = jnp.mean(hc, axis=(0, 2, 3), keepdims=True)
        var = jnp.mean((hc - mean) ** 2, axis=(0, 2, 3), keepdims=True)
        hc = (hc - mean) * lax.rsqrt(var + BN_EPS) * g[None, :, None, None] \
            + be[None, :, None, None]
        return jnp.maximum(hc, 0.0)

    h = conv_bn_relu(pooled, p["w1"], p["b1"], p["g1"], p["be1"])
    h = conv_bn_relu(h, p["w2"], p["b2"], p["g2"], p["be2"])
    return h


def make_params(key, in_channels, out_channels):
    mid = out_channels
    ks = jax.random.split(key, 8)
    return {
        "w1": 0.1 * jax.random.normal(ks[0], (mid, in_channels, 3, 3), jnp.float32),
        "b1": 0.05 * jax.random.normal(ks[1], (mid,), jnp.float32),
        "g1": 1.0 + 0.1 * jax.random.normal(ks[2], (mid,), jnp.float32),
        "be1": 0.05 * jax.random.normal(ks[3], (mid,), jnp.float32),
        "w2": 0.1 * jax.random.normal(ks[4], (out_channels, mid, 3, 3), jnp.float32),
        "b2": 0.05 * jax.random.normal(ks[5], (out_channels,), jnp.float32),
        "g2": 1.0 + 0.1 * jax.random.normal(ks[6], (out_channels,), jnp.float32),
        "be2": 0.05 * jax.random.normal(ks[7], (out_channels,), jnp.float32),
    }


if __name__ == "__main__":
    key = jax.random.PRNGKey(0)
    kx, kp = jax.random.split(key)

    N, Cin, Cout, H, W = 2, 4, 8, 16, 16
    x = jax.random.normal(kx, (N, Cin, H, W), jnp.float32)   # NCHW like PyTorch
    params = make_params(kp, Cin, Cout)

    out = jax.block_until_ready(down_pallas(x, params))
    assert out.shape == (N, Cout, H // 2, W // 2), out.shape

    # Tight check against a reference that matches the kernel's bf16 MXU
    # operands (f32 accumulation) -- validates the fused kernel logic.
    ref_bf16 = down_reference(x, params, conv_dtype=jnp.bfloat16)
    assert jnp.allclose(out, ref_bf16, atol=5e-3, rtol=5e-3), \
        float(jnp.max(jnp.abs(out - ref_bf16)))

    # Looser sanity check against the full-f32 reference (bf16 operand
    # rounding through two conv+BN stages is why the tolerance is widened).
    ref_f32 = down_reference(x, params, conv_dtype=jnp.float32)
    assert jnp.allclose(out, ref_f32, atol=2e-1, rtol=1e-1), \
        float(jnp.max(jnp.abs(out - ref_f32)))

    print("KERNEL_OK")
</pallas_src>

<mosaic_0001>
module attributes {stable_mosaic.version = 11 : i64} {
  func.func @_down_kernel(%arg0: memref<2x2x4x256xf32, #tpu.memory_space<vmem>>, %arg1: memref<1x256xf32, #tpu.memory_space<vmem>>, %arg2: memref<9x8x4xbf16, #tpu.memory_space<vmem>>, %arg3: memref<8x1xf32, #tpu.memory_space<vmem>>, %arg4: memref<8x1xf32, #tpu.memory_space<vmem>>, %arg5: memref<8x1xf32, #tpu.memory_space<vmem>>, %arg6: memref<9x8x8xbf16, #tpu.memory_space<vmem>>, %arg7: memref<8x1xf32, #tpu.memory_space<vmem>>, %arg8: memref<8x1xf32, #tpu.memory_space<vmem>>, %arg9: memref<8x1xf32, #tpu.memory_space<vmem>>, %arg10: memref<8x256xf32, #tpu.memory_space<vmem>>) attributes {dimension_semantics = [], scalar_prefetch = 0 : i64, scratch_operands = 0 : i64, tpu.core_type = #tpu.core_type<tc>} {
    %c0 = arith.constant 0 : index
    %c0_0 = arith.constant 0 : index
    %0 = vector.load %arg1[%c0, %c0_0] : memref<1x256xf32, #tpu.memory_space<vmem>>, vector<1x256xf32>
    %c0_1 = arith.constant 0 : index
    %c0_2 = arith.constant 0 : index
    %c0_3 = arith.constant 0 : index
    %c0_4 = arith.constant 0 : index
    %1 = vector.load %arg0[%c0_1, %c0_2, %c0_3, %c0_4] : memref<2x2x4x256xf32, #tpu.memory_space<vmem>>, vector<2x2x4x256xf32>
    %2 = vector.extract_strided_slice %1 {offsets = [0, 0, 0, 0], sizes = [1, 1, 4, 256], strides = [1, 1, 1, 1]} : vector<2x2x4x256xf32> to vector<1x1x4x256xf32>
    %3 = vector.shape_cast %2 : vector<1x1x4x256xf32> to vector<4x256xf32>
    %4 = vector.extract_strided_slice %1 {offsets = [0, 1, 0, 0], sizes = [1, 1, 4, 256], strides = [1, 1, 1, 1]} : vector<2x2x4x256xf32> to vector<1x1x4x256xf32>
    %5 = vector.shape_cast %4 : vector<1x1x4x256xf32> to vector<4x256xf32>
    %6 = arith.maximumf %3, %5 : vector<4x256xf32>
    %7 = vector.extract_strided_slice %1 {offsets = [1, 0, 0, 0], sizes = [1, 1, 4, 256], strides = [1, 1, 1, 1]} : vector<2x2x4x256xf32> to vector<1x1x4x256xf32>
    %8 = vector.shape_cast %7 : vector<1x1x4x256xf32> to vector<4x256xf32>
    %9 = vector.extract_strided_slice %1 {offsets = [1, 1, 0, 0], sizes = [1, 1, 4, 256], strides = [1, 1, 1, 1]} : vector<2x2x4x256xf32> to vector<1x1x4x256xf32>
    %10 = vector.shape_cast %9 : vector<1x1x4x256xf32> to vector<4x256xf32>
    %11 = arith.maximumf %8, %10 : vector<4x256xf32>
    %12 = arith.maximumf %6, %11 : vector<4x256xf32>
    %c0_5 = arith.constant 0 : index
    %c0_6 = arith.constant 0 : index
    %13 = vector.load %arg3[%c0_5, %c0_6] : memref<8x1xf32, #tpu.memory_space<vmem>>, vector<8x1xf32>
    %c11_i32 = arith.constant 11 : i32
    %14 = tpu.dynamic_rotate %12 by %c11_i32 dim 1 : vector<4x256xf32>, i32 -> vector<4x256xf32>
    %c0_7 = arith.constant 0 : index
    %c0_8 = arith.constant 0 : index
    %c0_9 = arith.constant 0 : index
    %15 = vector.load %arg2[%c0_7, %c0_8, %c0_9] : memref<9x8x4xbf16, #tpu.memory_space<vmem>>, vector<1x8x4xbf16>
    %16 = vector.shape_cast %15 : vector<1x8x4xbf16> to vector<8x4xbf16>
    %17 = arith.truncf %14 : vector<4x256xf32> to vector<4x256xbf16>
    %cst = arith.constant dense<0.000000e+00> : vector<8x256xf32>
    %18 = tpu.matmul %16, %17, %cst {dimension_numbers = #tpu.dot_dimension_numbers<[1], [0], [0], [1], [0, 0, 1, 1], [], []>} : vector<8x4xbf16>, vector<4x256xbf16>, vector<8x256xf32> -> vector<8x256xf32>
    %c10_i32 = arith.constant 10 : i32
    %19 = tpu.dynamic_rotate %12 by %c10_i32 dim 1 : vector<4x256xf32>, i32 -> vector<4x256xf32>
    %c1 = arith.constant 1 : index
    %c0_10 = arith.constant 0 : index
    %c0_11 = arith.constant 0 : index
    %20 = vector.load %arg2[%c1, %c0_10, %c0_11] : memref<9x8x4xbf16, #tpu.memory_space<vmem>>, vector<1x8x4xbf16>
    %21 = vector.shape_cast %20 : vector<1x8x4xbf16> to vector<8x4xbf16>
    %22 = arith.truncf %19 : vector<4x256xf32> to vector<4x256xbf16>
    %cst_12 = arith.constant dense<0.000000e+00> : vector<8x256xf32>
    %23 = tpu.matmul %21, %22, %cst_12 {dimension_numbers = #tpu.dot_dimension_numbers<[1], [0], [0], [1], [0, 0, 1, 1], [], []>} : vector<8x4xbf16>, vector<4x256xbf16>, vector<8x256xf32> -> vector<8x256xf32>
    %24 = arith.addf %18, %23 : vector<8x256xf32>
    %c9_i32 = arith.constant 9 : i32
    %25 = tpu.dynamic_rotate %12 by %c9_i32 dim 1 : vector<4x256xf32>, i32 -> vector<4x256xf32>
    %c2 = arith.constant 2 : index
    %c0_13 = arith.constant 0 : index
    %c0_14 = arith.constant 0 : index
    %26 = vector.load %arg2[%c2, %c0_13, %c0_14] : memref<9x8x4xbf16, #tpu.memory_space<vmem>>, vector<1x8x4xbf16>
    %27 = vector.shape_cast %26 : vector<1x8x4xbf16> to vector<8x4xbf16>
    %28 = arith.truncf %25 : vector<4x256xf32> to vector<4x256xbf16>
    %cst_15 = arith.constant dense<0.000000e+00> : vector<8x256xf32>
    %29 = tpu.matmul %27, %28, %cst_15 {dimension_numbers = #tpu.dot_dimension_numbers<[1], [0], [0], [1], [0, 0, 1, 1], [], []>} : vector<8x4xbf16>, vector<4x256xbf16>, vector<8x256xf32> -> vector<8x256xf32>
    %30 = arith.addf %24, %29 : vector<8x256xf32>
    %c1_i32 = arith.constant 1 : i32
    %31 = tpu.dynamic_rotate %12 by %c1_i32 dim 1 : vector<4x256xf32>, i32 -> vector<4x256xf32>
    %c3 = arith.constant 3 : index
    %c0_16 = arith.constant 0 : index
    %c0_17 = arith.constant 0 : index
    %32 = vector.load %arg2[%c3, %c0_16, %c0_17] : memref<9x8x4xbf16, #tpu.memory_space<vmem>>, vector<1x8x4xbf16>
    %33 = vector.shape_cast %32 : vector<1x8x4xbf16> to vector<8x4xbf16>
    %34 = arith.truncf %31 : vector<4x256xf32> to vector<4x256xbf16>
    %cst_18 = arith.constant dense<0.000000e+00> : vector<8x256xf32>
    %35 = tpu.matmul %33, %34, %cst_18 {dimension_numbers = #tpu.dot_dimension_numbers<[1], [0], [0], [1], [0, 0, 1, 1], [], []>} : vector<8x4xbf16>, vector<4x256xbf16>, vector<8x256xf32> -> vector<8x256xf32>
    %36 = arith.addf %30, %35 : vector<8x256xf32>
    %c4 = arith.constant 4 : index
    %c0_19 = arith.constant 0 : index
    %c0_20 = arith.constant 0 : index
    %37 = vector.load %arg2[%c4, %c0_19, %c0_20] : memref<9x8x4xbf16, #tpu.memory_space<vmem>>, vector<1x8x4xbf16>
    %38 = vector.shape_cast %37 : vector<1x8x4xbf16> to vector<8x4xbf16>
    %39 = arith.truncf %12 : vector<4x256xf32> to vector<4x256xbf16>
    %cst_21 = arith.constant dense<0.000000e+00> : vector<8x256xf32>
    %40 = tpu.matmul %38, %39, %cst_21 {dimension_numbers = #tpu.dot_dimension_numbers<[1], [0], [0], [1], [0, 0, 1, 1], [], []>} : vector<8x4xbf16>, vector<4x256xbf16>, vector<8x256xf32> -> vector<8x256xf32>
    %41 = arith.addf %36, %40 : vector<8x256xf32>
    %c255_i32 = arith.constant 255 : i32
    %42 = tpu.dynamic_rotate %12 by %c255_i32 dim 1 : vector<4x256xf32>, i32 -> vector<4x256xf32>
    %c5 = arith.constant 5 : index
    %c0_22 = arith.constant 0 : index
    %c0_23 = arith.constant 0 : index
    %43 = vector.load %arg2[%c5, %c0_22, %c0_23] : memref<9x8x4xbf16, #tpu.memory_space<vmem>>, vector<1x8x4xbf16>
    %44 = vector.shape_cast %43 : vector<1x8x4xbf16> to vector<8x4xbf16>
    %45 = arith.truncf %42 : vector<4x256xf32> to vector<4x256xbf16>
    %cst_24 = arith.constant dense<0.000000e+00> : vector<8x256xf32>
    %46 = tpu.matmul %44, %45, %cst_24 {dimension_numbers = #tpu.dot_dimension_numbers<[1], [0], [0], [1], [0, 0, 1, 1], [], []>} : vector<8x4xbf16>, vector<4x256xbf16>, vector<8x256xf32> -> vector<8x256xf32>
    %47 = arith.addf %41, %46 : vector<8x256xf32>
    %c247_i32 = arith.constant 247 : i32
    %48 = tpu.dynamic_rotate %12 by %c247_i32 dim 1 : vector<4x256xf32>, i32 -> vector<4x256xf32>
    %c6 = arith.constant 6 : index
    %c0_25 = arith.constant 0 : index
    %c0_26 = arith.constant 0 : index
    %49 = vector.load %arg2[%c6, %c0_25, %c0_26] : memref<9x8x4xbf16, #tpu.memory_space<vmem>>, vector<1x8x4xbf16>
    %50 = vector.shape_cast %49 : vector<1x8x4xbf16> to vector<8x4xbf16>
    %51 = arith.truncf %48 : vector<4x256xf32> to vector<4x256xbf16>
    %cst_27 = arith.constant dense<0.000000e+00> : vector<8x256xf32>
    %52 = tpu.matmul %50, %51, %cst_27 {dimension_numbers = #tpu.dot_dimension_numbers<[1], [0], [0], [1], [0, 0, 1, 1], [], []>} : vector<8x4xbf16>, vector<4x256xbf16>, vector<8x256xf32> -> vector<8x256xf32>
    %53 = arith.addf %47, %52 : vector<8x256xf32>
    %c246_i32 = arith.constant 246 : i32
    %54 = tpu.dynamic_rotate %12 by %c246_i32 dim 1 : vector<4x256xf32>, i32 -> vector<4x256xf32>
    %c7 = arith.constant 7 : index
    %c0_28 = arith.constant 0 : index
    %c0_29 = arith.constant 0 : index
    %55 = vector.load %arg2[%c7, %c0_28, %c0_29] : memref<9x8x4xbf16, #tpu.memory_space<vmem>>, vector<1x8x4xbf16>
    %56 = vector.shape_cast %55 : vector<1x8x4xbf16> to vector<8x4xbf16>
    %57 = arith.truncf %54 : vector<4x256xf32> to vector<4x256xbf16>
    %cst_30 = arith.constant dense<0.000000e+00> : vector<8x256xf32>
    %58 = tpu.matmul %56, %57, %cst_30 {dimension_numbers = #tpu.dot_dimension_numbers<[1], [0], [0], [1], [0, 0, 1, 1], [], []>} : vector<8x4xbf16>, vector<4x256xbf16>, vector<8x256xf32> -> vector<8x256xf32>
    %59 = arith.addf %53, %58 : vector<8x256xf32>
    %c245_i32 = arith.constant 245 : i32
    %60 = tpu.dynamic_rotate %12 by %c245_i32 dim 1 : vector<4x256xf32>, i32 -> vector<4x256xf32>
    %c8 = arith.constant 8 : index
    %c0_31 = arith.constant 0 : index
    %c0_32 = arith.constant 0 : index
    %61 = vector.load %arg2[%c8, %c0_31, %c0_32] : memref<9x8x4xbf16, #tpu.memory_space<vmem>>, vector<1x8x4xbf16>
    %62 = vector.shape_cast %61 : vector<1x8x4xbf16> to vector<8x4xbf16>
    %63 = arith.truncf %60 : vector<4x256xf32> to vector<4x256xbf16>
    %cst_33 = arith.constant dense<0.000000e+00> : vector<8x256xf32>
    %64 = tpu.matmul %62, %63, %cst_33 {dimension_numbers = #tpu.dot_dimension_numbers<[1], [0], [0], [1], [0, 0, 1, 1], [], []>} : vector<8x4xbf16>, vector<4x256xbf16>, vector<8x256xf32> -> vector<8x256xf32>
    %65 = arith.addf %59, %64 : vector<8x256xf32>
    %66 = vector.broadcast %13 : vector<8x1xf32> to vector<8x256xf32>
    %67 = arith.addf %65, %66 : vector<8x256xf32>
    %c0_34 = arith.constant 0 : index
    %c0_35 = arith.constant 0 : index
    %68 = vector.load %arg4[%c0_34, %c0_35] : memref<8x1xf32, #tpu.memory_space<vmem>>, vector<8x1xf32>
    %c0_36 = arith.constant 0 : index
    %c0_37 = arith.constant 0 : index
    %69 = vector.load %arg5[%c0_36, %c0_37] : memref<8x1xf32, #tpu.memory_space<vmem>>, vector<8x1xf32>
    %70 = vector.broadcast %0 : vector<1x256xf32> to vector<8x256xf32>
    %71 = arith.mulf %67, %70 : vector<8x256xf32>
    %cst_38 = arith.constant dense<0.000000e+00> : vector<8xf32>
    %72 = vector.multi_reduction <add>, %71, %cst_38 [1] : vector<8x256xf32> to vector<8xf32>
    %73 = vector.shape_cast %72 : vector<8xf32> to vector<8x1xf32>
    %74 = arith.mulf %71, %71 : vector<8x256xf32>
    %cst_39 = arith.constant dense<0.000000e+00> : vector<8xf32>
    %75 = vector.multi_reduction <add>, %74, %cst_39 [1] : vector<8x256xf32> to vector<8xf32>
    %76 = vector.shape_cast %75 : vector<8xf32> to vector<8x1xf32>
    %cst_40 = arith.constant 7.812500e-03 : f32
    %77 = vector.broadcast %cst_40 : f32 to vector<8x1xf32>
    %78 = arith.mulf %73, %77 : vector<8x1xf32>
    %cst_41 = arith.constant 7.812500e-03 : f32
    %79 = vector.broadcast %cst_41 : f32 to vector<8x1xf32>
    %80 = arith.mulf %76, %79 : vector<8x1xf32>
    %81 = arith.mulf %78, %78 : vector<8x1xf32>
    %82 = arith.subf %80, %81 : vector<8x1xf32>
    %83 = vector.broadcast %78 : vector<8x1xf32> to vector<8x256xf32>
    %84 = arith.subf %67, %83 : vector<8x256xf32>
    %cst_42 = arith.constant 9.99999974E-6 : f32
    %85 = vector.broadcast %cst_42 : f32 to vector<8x1xf32>
    %86 = arith.addf %82, %85 : vector<8x1xf32>
    %87 = math.rsqrt %86 : vector<8x1xf32>
    %88 = arith.mulf %87, %68 : vector<8x1xf32>
    %89 = vector.broadcast %88 : vector<8x1xf32> to vector<8x256xf32>
    %90 = arith.mulf %84, %89 : vector<8x256xf32>
    %91 = vector.broadcast %69 : vector<8x1xf32> to vector<8x256xf32>
    %92 = arith.addf %90, %91 : vector<8x256xf32>
    %cst_43 = arith.constant 0.000000e+00 : f32
    %93 = vector.broadcast %cst_43 : f32 to vector<8x256xf32>
    %94 = arith.maximumf %92, %93 : vector<8x256xf32>
    %95 = vector.broadcast %0 : vector<1x256xf32> to vector<8x256xf32>
    %96 = arith.mulf %94, %95 : vector<8x256xf32>
    %c0_44 = arith.constant 0 : index
    %c0_45 = arith.constant 0 : index
    %97 = vector.load %arg7[%c0_44, %c0_45] : memref<8x1xf32, #tpu.memory_space<vmem>>, vector<8x1xf32>
    %c11_i32_46 = arith.constant 11 : i32
    %98 = tpu.dynamic_rotate %96 by %c11_i32_46 dim 1 : vector<8x256xf32>, i32 -> vector<8x256xf32>
    %c0_47 = arith.constant 0 : index
    %c0_48 = arith.constant 0 : index
    %c0_49 = arith.constant 0 : index
    %99 = vector.load %arg6[%c0_47, %c0_48, %c0_49] : memref<9x8x8xbf16, #tpu.memory_space<vmem>>, vector<1x8x8xbf16>
    %100 = vector.shape_cast %99 : vector<1x8x8xbf16> to vector<8x8xbf16>
    %101 = arith.truncf %98 : vector<8x256xf32> to vector<8x256xbf16>
    %cst_50 = arith.constant dense<0.000000e+00> : vector<8x256xf32>
    %102 = tpu.matmul %100, %101, %cst_50 {dimension_numbers = #tpu.dot_dimension_numbers<[1], [0], [0], [1], [0, 0, 1, 1], [], []>} : vector<8x8xbf16>, vector<8x256xbf16>, vector<8x256xf32> -> vector<8x256xf32>
    %c10_i32_51 = arith.constant 10 : i32
    %103 = tpu.dynamic_rotate %96 by %c10_i32_51 dim 1 : vector<8x256xf32>, i32 -> vector<8x256xf32>
    %c1_52 = arith.constant 1 : index
    %c0_53 = arith.constant 0 : index
    %c0_54 = arith.constant 0 : index
    %104 = vector.load %arg6[%c1_52, %c0_53, %c0_54] : memref<9x8x8xbf16, #tpu.memory_space<vmem>>, vector<1x8x8xbf16>
    %105 = vector.shape_cast %104 : vector<1x8x8xbf16> to vector<8x8xbf16>
    %106 = arith.truncf %103 : vector<8x256xf32> to vector<8x256xbf16>
    %cst_55 = arith.constant dense<0.000000e+00> : vector<8x256xf32>
    %107 = tpu.matmul %105, %106, %cst_55 {dimension_numbers = #tpu.dot_dimension_numbers<[1], [0], [0], [1], [0, 0, 1, 1], [], []>} : vector<8x8xbf16>, vector<8x256xbf16>, vector<8x256xf32> -> vector<8x256xf32>
    %108 = arith.addf %102, %107 : vector<8x256xf32>
    %c9_i32_56 = arith.constant 9 : i32
    %109 = tpu.dynamic_rotate %96 by %c9_i32_56 dim 1 : vector<8x256xf32>, i32 -> vector<8x256xf32>
    %c2_57 = arith.constant 2 : index
    %c0_58 = arith.constant 0 : index
    %c0_59 = arith.constant 0 : index
    %110 = vector.load %arg6[%c2_57, %c0_58, %c0_59] : memref<9x8x8xbf16, #tpu.memory_space<vmem>>, vector<1x8x8xbf16>
    %111 = vector.shape_cast %110 : vector<1x8x8xbf16> to vector<8x8xbf16>
    %112 = arith.truncf %109 : vector<8x256xf32> to vector<8x256xbf16>
    %cst_60 = arith.constant dense<0.000000e+00> : vector<8x256xf32>
    %113 = tpu.matmul %111, %112, %cst_60 {dimension_numbers = #tpu.dot_dimension_numbers<[1], [0], [0], [1], [0, 0, 1, 1], [], []>} : vector<8x8xbf16>, vector<8x256xbf16>, vector<8x256xf32> -> vector<8x256xf32>
    %114 = arith.addf %108, %113 : vector<8x256xf32>
    %c1_i32_61 = arith.constant 1 : i32
    %115 = tpu.dynamic_rotate %96 by %c1_i32_61 dim 1 : vector<8x256xf32>, i32 -> vector<8x256xf32>
    %c3_62 = arith.constant 3 : index
    %c0_63 = arith.constant 0 : index
    %c0_64 = arith.constant 0 : index
    %116 = vector.load %arg6[%c3_62, %c0_63, %c0_64] : memref<9x8x8xbf16, #tpu.memory_space<vmem>>, vector<1x8x8xbf16>
    %117 = vector.shape_cast %116 : vector<1x8x8xbf16> to vector<8x8xbf16>
    %118 = arith.truncf %115 : vector<8x256xf32> to vector<8x256xbf16>
    %cst_65 = arith.constant dense<0.000000e+00> : vector<8x256xf32>
    %119 = tpu.matmul %117, %118, %cst_65 {dimension_numbers = #tpu.dot_dimension_numbers<[1], [0], [0], [1], [0, 0, 1, 1], [], []>} : vector<8x8xbf16>, vector<8x256xbf16>, vector<8x256xf32> -> vector<8x256xf32>
    %120 = arith.addf %114, %119 : vector<8x256xf32>
    %c4_66 = arith.constant 4 : index
    %c0_67 = arith.constant 0 : index
    %c0_68 = arith.constant 0 : index
    %121 = vector.load %arg6[%c4_66, %c0_67, %c0_68] : memref<9x8x8xbf16, #tpu.memory_space<vmem>>, vector<1x8x8xbf16>
    %122 = vector.shape_cast %121 : vector<1x8x8xbf16> to vector<8x8xbf16>
    %123 = arith.truncf %96 : vector<8x256xf32> to vector<8x256xbf16>
    %cst_69 = arith.constant dense<0.000000e+00> : vector<8x256xf32>
    %124 = tpu.matmul %122, %123, %cst_69 {dimension_numbers = #tpu.dot_dimension_numbers<[1], [0], [0], [1], [0, 0, 1, 1], [], []>} : vector<8x8xbf16>, vector<8x256xbf16>, vector<8x256xf32> -> vector<8x256xf32>
    %125 = arith.addf %120, %124 : vector<8x256xf32>
    %c255_i32_70 = arith.constant 255 : i32
    %126 = tpu.dynamic_rotate %96 by %c255_i32_70 dim 1 : vector<8x256xf32>, i32 -> vector<8x256xf32>
    %c5_71 = arith.constant 5 : index
    %c0_72 = arith.constant 0 : index
    %c0_73 = arith.constant 0 : index
    %127 = vector.load %arg6[%c5_71, %c0_72, %c0_73] : memref<9x8x8xbf16, #tpu.memory_space<vmem>>, vector<1x8x8xbf16>
    %128 = vector.shape_cast %127 : vector<1x8x8xbf16> to vector<8x8xbf16>
    %129 = arith.truncf %126 : vector<8x256xf32> to vector<8x256xbf16>
    %cst_74 = arith.constant dense<0.000000e+00> : vector<8x256xf32>
    %130 = tpu.matmul %128, %129, %cst_74 {dimension_numbers = #tpu.dot_dimension_numbers<[1], [0], [0], [1], [0, 0, 1, 1], [], []>} : vector<8x8xbf16>, vector<8x256xbf16>, vector<8x256xf32> -> vector<8x256xf32>
    %131 = arith.addf %125, %130 : vector<8x256xf32>
    %c247_i32_75 = arith.constant 247 : i32
    %132 = tpu.dynamic_rotate %96 by %c247_i32_75 dim 1 : vector<8x256xf32>, i32 -> vector<8x256xf32>
    %c6_76 = arith.constant 6 : index
    %c0_77 = arith.constant 0 : index
    %c0_78 = arith.constant 0 : index
    %133 = vector.load %arg6[%c6_76, %c0_77, %c0_78] : memref<9x8x8xbf16, #tpu.memory_space<vmem>>, vector<1x8x8xbf16>
    %134 = vector.shape_cast %133 : vector<1x8x8xbf16> to vector<8x8xbf16>
    %135 = arith.truncf %132 : vector<8x256xf32> to vector<8x256xbf16>
    %cst_79 = arith.constant dense<0.000000e+00> : vector<8x256xf32>
    %136 = tpu.matmul %134, %135, %cst_79 {dimension_numbers = #tpu.dot_dimension_numbers<[1], [0], [0], [1], [0, 0, 1, 1], [], []>} : vector<8x8xbf16>, vector<8x256xbf16>, vector<8x256xf32> -> vector<8x256xf32>
    %137 = arith.addf %131, %136 : vector<8x256xf32>
    %c246_i32_80 = arith.constant 246 : i32
    %138 = tpu.dynamic_rotate %96 by %c246_i32_80 dim 1 : vector<8x256xf32>, i32 -> vector<8x256xf32>
    %c7_81 = arith.constant 7 : index
    %c0_82 = arith.constant 0 : index
    %c0_83 = arith.constant 0 : index
    %139 = vector.load %arg6[%c7_81, %c0_82, %c0_83] : memref<9x8x8xbf16, #tpu.memory_space<vmem>>, vector<1x8x8xbf16>
    %140 = vector.shape_cast %139 : vector<1x8x8xbf16> to vector<8x8xbf16>
    %141 = arith.truncf %138 : vector<8x256xf32> to vector<8x256xbf16>
    %cst_84 = arith.constant dense<0.000000e+00> : vector<8x256xf32>
    %142 = tpu.matmul %140, %141, %cst_84 {dimension_numbers = #tpu.dot_dimension_numbers<[1], [0], [0], [1], [0, 0, 1, 1], [], []>} : vector<8x8xbf16>, vector<8x256xbf16>, vector<8x256xf32> -> vector<8x256xf32>
    %143 = arith.addf %137, %142 : vector<8x256xf32>
    %c245_i32_85 = arith.constant 245 : i32
    %144 = tpu.dynamic_rotate %96 by %c245_i32_85 dim 1 : vector<8x256xf32>, i32 -> vector<8x256xf32>
    %c8_86 = arith.constant 8 : index
    %c0_87 = arith.constant 0 : index
    %c0_88 = arith.constant 0 : index
    %145 = vector.load %arg6[%c8_86, %c0_87, %c0_88] : memref<9x8x8xbf16, #tpu.memory_space<vmem>>, vector<1x8x8xbf16>
    %146 = vector.shape_cast %145 : vector<1x8x8xbf16> to vector<8x8xbf16>
    %147 = arith.truncf %144 : vector<8x256xf32> to vector<8x256xbf16>
    %cst_89 = arith.constant dense<0.000000e+00> : vector<8x256xf32>
    %148 = tpu.matmul %146, %147, %cst_89 {dimension_numbers = #tpu.dot_dimension_numbers<[1], [0], [0], [1], [0, 0, 1, 1], [], []>} : vector<8x8xbf16>, vector<8x256xbf16>, vector<8x256xf32> -> vector<8x256xf32>
    %149 = arith.addf %143, %148 : vector<8x256xf32>
    %150 = vector.broadcast %97 : vector<8x1xf32> to vector<8x256xf32>
    %151 = arith.addf %149, %150 : vector<8x256xf32>
    %c0_90 = arith.constant 0 : index
    %c0_91 = arith.constant 0 : index
    %152 = vector.load %arg8[%c0_90, %c0_91] : memref<8x1xf32, #tpu.memory_space<vmem>>, vector<8x1xf32>
    %c0_92 = arith.constant 0 : index
    %c0_93 = arith.constant 0 : index
    %153 = vector.load %arg9[%c0_92, %c0_93] : memref<8x1xf32, #tpu.memory_space<vmem>>, vector<8x1xf32>
    %154 = vector.broadcast %0 : vector<1x256xf32> to vector<8x256xf32>
    %155 = arith.mulf %151, %154 : vector<8x256xf32>
    %cst_94 = arith.constant dense<0.000000e+00> : vector<8xf32>
    %156 = vector.multi_reduction <add>, %155, %cst_94 [1] : vector<8x256xf32> to vector<8xf32>
    %157 = vector.shape_cast %156 : vector<8xf32> to vector<8x1xf32>
    %158 = arith.mulf %155, %155 : vector<8x256xf32>
    %cst_95 = arith.constant dense<0.000000e+00> : vector<8xf32>
    %159 = vector.multi_reduction <add>, %158, %cst_95 [1] : vector<8x256xf32> to vector<8xf32>
    %160 = vector.shape_cast %159 : vector<8xf32> to vector<8x1xf32>
    %cst_96 = arith.constant 7.812500e-03 : f32
    %161 = vector.broadcast %cst_96 : f32 to vector<8x1xf32>
    %162 = arith.mulf %157, %161 : vector<8x1xf32>
    %cst_97 = arith.constant 7.812500e-03 : f32
    %163 = vector.broadcast %cst_97 : f32 to vector<8x1xf32>
    %164 = arith.mulf %160, %163 : vector<8x1xf32>
    %165 = arith.mulf %162, %162 : vector<8x1xf32>
    %166 = arith.subf %164, %165 : vector<8x1xf32>
    %167 = vector.broadcast %162 : vector<8x1xf32> to vector<8x256xf32>
    %168 = arith.subf %151, %167 : vector<8x256xf32>
    %cst_98 = arith.constant 9.99999974E-6 : f32
    %169 = vector.broadcast %cst_98 : f32 to vector<8x1xf32>
    %170 = arith.addf %166, %169 : vector<8x1xf32>
    %171 = math.rsqrt %170 : vector<8x1xf32>
    %172 = arith.mulf %171, %152 : vector<8x1xf32>
    %173 = vector.broadcast %172 : vector<8x1xf32> to vector<8x256xf32>
    %174 = arith.mulf %168, %173 : vector<8x256xf32>
    %175 = vector.broadcast %153 : vector<8x1xf32> to vector<8x256xf32>
    %176 = arith.addf %174, %175 : vector<8x256xf32>
    %cst_99 = arith.constant 0.000000e+00 : f32
    %177 = vector.broadcast %cst_99 : f32 to vector<8x256xf32>
    %178 = arith.maximumf %176, %177 : vector<8x256xf32>
    %179 = vector.broadcast %0 : vector<1x256xf32> to vector<8x256xf32>
    %180 = arith.mulf %178, %179 : vector<8x256xf32>
    %c0_100 = arith.constant 0 : index
    %c0_101 = arith.constant 0 : index
    %181 = vector.load %arg10[%c0_100, %c0_101] : memref<8x256xf32, #tpu.memory_space<vmem>>, vector<8x256xf32>
    tpu.vector_store %arg10[%c0_100, %c0_101], %180 {strides = array<i32>} : memref<8x256xf32, #tpu.memory_space<vmem>>, vector<8x256xf32>,
    return
  }
}

</mosaic_0001>

<bundles_post_ra>
// kernel: tpu_custom_call.1
= control target key start
LH: loop header
LB: loop body
LE: loop exit
PB: predicated region body
PF: predicated region fallthrough
CT: control target
= control target key end

     0   :  { %s1808_s0 = inlined_call_operand.vmem [shape: f32[2,2,4,256], index: 0, kind: input, shape index: {}]   ;;  %s1809_s1 = inlined_call_operand.vmem [shape: f32[1,256], index: 1, kind: input, shape index: {}]   ;;  %s1810_s2 = inlined_call_operand.vmem [shape: bf16[9,8,4], index: 2, kind: input, shape index: {}]   ;;  %s1811_s3 = inlined_call_operand.vmem [shape: f32[8,1], index: 3, kind: input, shape index: {}]   ;;  %s1812_s4 = inlined_call_operand.vmem [shape: f32[8,1], index: 4, kind: input, shape index: {}]   ;;  %s1813_s5 = inlined_call_operand.vmem [shape: f32[8,1], index: 5, kind: input, shape index: {}]   ;;  %s1814_s6 = inlined_call_operand.vmem [shape: bf16[9,8,8], index: 6, kind: input, shape index: {}]   ;;  %s1815_s7 = inlined_call_operand.vmem [shape: f32[8,1], index: 7, kind: input, shape index: {}]   ;;  %s1816_s8 = inlined_call_operand.vmem [shape: f32[8,1], index: 8, kind: input, shape index: {}]   ;;  %s1817_s9 = inlined_call_operand.vmem [shape: f32[8,1], index: 9, kind: input, shape index: {}]   ;;  %s1818_s10 = inlined_call_operand.hbm [shape: f32[8,256], index: 10, kind: output, shape index: {}]  }
   0x1   :  { %v38_v0 = vld [vmem:[%s1808_s0] sm:$0xff]  ;;  %v39_v1 = vld [vmem:[%s1808_s0 + $0x8] sm:$0xff]  ;;  %v40_v2 = vld [vmem:[%s1808_s0 + $0x10] sm:$0xff] }
   0x2   :  { %v41_v3 = vld [vmem:[%s1808_s0 + $0x18] sm:$0xff]  ;;  %v42_v4 = vmax.f32 %v38_v0, %v39_v1 }
   0x3   :  { %15 = vsyncpa [#allocation3], 0  ;;  %v43_v5 = vmax.f32 %v40_v2, %v41_v3  ;;  %v1449_v7 = vmov 0   ;;  %s1450_s0 = smov 10   ;;  %s1451_s21 = smov 9   ;;  %v45_v10 = vld [vmem:[%s1811_s3] sm:$0xff]  ;;  %v53_v11 = vlaneseq }
   0x4   :  { %115 = vmatprep.mubr.bf16.mxu0 %v1449_v7  ;;  %165 = vmatprep.mubr.bf16.mxu1 %v1449_v7  ;;  %s1452_s22 = smov 11   ;;  %s1453_s23 = smov 1   ;;  %vm76_vm2 = vcmask 1041408   ;;  %vm72_vm3 = vcmask 31744   ;;  %v1277_v36 = vld [vmem:[%s1810_s2 + $0x4] sm:$0xf] }
   0x5   :  { %v1526_v6 = vmax.f32 %v42_v4, %v43_v5  ;;  %1379 = vset.pattern.permute.xlu0 %v1449_v7  ;;  %1380 = vset.pattern.permute.xlu1 %v1449_v7  ;;  %s1454_s24 = smov 127   ;;  %s1455_s25 = smov 119   ;;  %v1550_v12 = vand.u32 127, %v53_v11  ;;  %v58_v52 = vld [vmem:[%s1810_s2] sm:$0xf]  ;;  %vm689_vm10 = vcmask 1043456  }
   0x6   :  { %s1456_s26 = smov 118   ;;  %s1457_s27 = smov 117   ;;  %v1282_v63 = vld [vmem:[%s1810_s2 + $0x8] sm:$0xf]  ;;  %vm685_vm11 = vcmask 64512  }
   0x7   :  { %v1534_v8 = vcombine.high %v1526_v6, %v1526_v6  ;;  %vm65_vm0 = vcmp.lt.s32.totalorder %v1550_v12, 10  ;;  %vm178_vm1 = vcmp.lt.s32.totalorder %v1550_v12, 9  ;;  %vm55_vm4 = vcmp.lt.s32.totalorder %v1550_v12, 11 }
   0x8   :  { %vm241_vm5 = vcmp.lt.s32.totalorder %v1550_v12, 1  ;;  %vm360_vm6 = vcmp.lt.s32.totalorder %v1550_v12, 127  ;;  %vm423_vm7 = vcmp.lt.s32.totalorder %v1550_v12, 119  ;;  %v302_v56 = vpack.c.bf16 %v1526_v6, %v1526_v6 }
   0x9   :  { %v1339_v9 = vpack.i.bf16 %v1534_v8, %v1526_v6  ;;  %v303_v35 = vpack.c.bf16 %v1534_v8, %v1534_v8  ;;  %vm486_vm8 = vcmp.lt.s32.totalorder %v1550_v12, 118  ;;  %vm549_vm9 = vcmp.lt.s32.totalorder %v1550_v12, 117  ;;  %v1285_v8 = vld [vmem:[%s1810_s2 + $0xc] sm:$0xf]  ;;  %v1323_v12 = vld [vmem:[%s1814_s6 + $0x1c] sm:$0xf] }
   0xa   :  { %v308_v0 = vsel %vm76_vm2, %v302_v56, 0 }
   0xb   :  { %1340 = vrot.lane.b32.xlu0 %v1339_v9, %s1450_s0  ;;  %1350 = vrot.lane.b32.xlu1 %v1339_v9, %s1451_s21 }
   0xf   :  { %1345 = vrot.lane.b32.xlu0 %v1339_v9, %s1452_s22  ;;  %1355 = vrot.lane.b32.xlu1 %v1339_v9, %s1453_s23 }
  0x13   :  { %1360 = vrot.lane.b32.xlu0 %v1339_v9, %s1454_s24  ;;  %1365 = vrot.lane.b32.xlu1 %v1339_v9, %s1455_s25 }
  0x17   :  { %1370 = vrot.lane.b32.xlu0 %v1339_v9, %s1456_s26  ;;  %1375 = vrot.lane.b32.xlu1 %v1339_v9, %s1457_s27 }
  0x1b   :  { %610 = vperm.xlu0 %1379, %v45_v10  }
  0x7d   :  { %v1341_v13 = vpop.permute.xlu0 %1340  ;;  %v1351_v14 = vpop.permute.xlu1 %1350 }
  0x7e   :  { %v1343_v15 = vunpack.i.h.bf16 %v1341_v13  ;;  %v1342_v16 = vunpack.i.l.bf16 %v1341_v13  ;;  %v1353_v17 = vunpack.i.h.bf16 %v1351_v14  ;;  %v1352_v18 = vunpack.i.l.bf16 %v1351_v14 }
  0x80   :  { %v66_v19 = vsel %vm65_vm0, %v1342_v16, %v1343_v15  ;;  %v67_v20 = vsel %vm65_vm0, %v1343_v15, %v1342_v16  ;;  %v179_v21 = vsel %vm178_vm1, %v1352_v18, %v1353_v17  ;;  %v180_v22 = vsel %vm178_vm1, %v1353_v17, %v1352_v18  ;;  %v1288_v16 = vld [vmem:[%s1810_s2 + $0x10] sm:$0xf] }
  0x81   :  { %v1346_v23 = vpop.permute.xlu0 %1345  ;;  %v71_v24 = vpack.c.bf16 %v66_v19, %v66_v19  ;;  %v70_v25 = vpack.c.bf16 %v67_v20, %v67_v20  ;;  %v184_v26 = vpack.c.bf16 %v179_v21, %v179_v21  ;;  %v1356_v27 = vpop.permute.xlu1 %1355  ;;  %v183_v28 = vpack.c.bf16 %v180_v22, %v180_v22  ;;  %v1291_v21 = vld [vmem:[%s1810_s2 + $0x14] sm:$0xf] }
  0x82   :  { %v1348_v29 = vunpack.i.h.bf16 %v1346_v23  ;;  %v1347_v30 = vunpack.i.l.bf16 %v1346_v23  ;;  %v1358_v31 = vunpack.i.h.bf16 %v1356_v27  ;;  %v1357_v32 = vunpack.i.l.bf16 %v1356_v27  ;;  %v1300_v27 = vld [vmem:[%s1810_s2 + $0x20] sm:$0xf] }
  0x83   :  { %1278 = vmatprep.subr.msk.bf16.mxu0 %vm76_vm2, %v71_v24  ;;  %v78_v33 = vsel %vm76_vm2, %v70_v25, 0  ;;  %v189_v34 = vsel %vm76_vm2, %v183_v28, 0  ;;  %v1294_v24 = vld [vmem:[%s1810_s2 + $0x18] sm:$0xf] }
  0x84   :  { %84 = vmatpush1.bf16.msra.mxu0 %v78_v33  ;;  %v56_v37 = vsel %vm55_vm4, %v1347_v30, %v1348_v29  ;;  %v57_v38 = vsel %vm55_vm4, %v1348_v29, %v1347_v30  ;;  %v242_v39 = vsel %vm241_vm5, %v1357_v32, %v1358_v31  ;;  %v243_v40 = vsel %vm241_vm5, %v1358_v31, %v1357_v32 }
  0x85   :  { %v60_v41 = vpack.c.bf16 %v56_v37, %v56_v37  ;;  %v59_v42 = vpack.c.bf16 %v57_v38, %v57_v38  ;;  %v247_v43 = vpack.c.bf16 %v242_v39, %v242_v39  ;;  %1283 = vmatprep.subr.msk.bf16.mxu0 %vm76_vm2, %v184_v26  ;;  %v246_v44 = vpack.c.bf16 %v243_v40, %v243_v40  ;;  %v1361_v45 = vpop.permute.xlu0 %1360  ;;  %v1366_v46 = vpop.permute.xlu1 %1365  ;;  %v1297_v26 = vld [vmem:[%s1810_s2 + $0x1c] sm:$0xf] }
  0x86   :  { %v1363_v47 = vunpack.i.h.bf16 %v1361_v45  ;;  %v1362_v48 = vunpack.i.l.bf16 %v1361_v45  ;;  %v1368_v49 = vunpack.i.h.bf16 %v1366_v46  ;;  %v1367_v50 = vunpack.i.l.bf16 %v1366_v46 }
  0x87   :  { %1279 = vmatmul.mubr.msk.bf16.vlgmr.msra.gmra.mrb[0].mxu0 %vm72_vm3, %v1277_v36  ;;  %1280 = vmatprep.subr.msk.bf16.mxu1 %vm76_vm2, %v60_v41  ;;  %v128_v51 = vsel %vm76_vm2, %v59_v42, 0  ;;  %v252_v54 = vsel %vm76_vm2, %v246_v44, 0 }
  0x88   :  { %134 = vmatpush1.bf16.msra.mxu1 %v128_v51  ;;  %195 = vmatpush1.bf16.msra.mxu0 %v189_v34  ;;  %v362_v53 = vsel %vm360_vm6, %v1363_v47, %v1362_v48  ;;  %v425_v58 = vsel %vm423_vm7, %v1368_v49, %v1367_v50  ;;  %v361_v59 = vsel %vm360_vm6, %v1362_v48, %v1363_v47 }
  0x89   :  { %226 = vmatprep.mubr.bf16.mxu0 %v1449_v7  ;;  %1286 = vmatprep.subr.msk.bf16.mxu1 %vm76_vm2, %v247_v43  ;;  %v366_v55 = vpack.c.bf16 %v362_v53, %v362_v53  ;;  %v1371_v57 = vpop.permute.xlu0 %1370  ;;  %v1376_v62 = vpop.permute.xlu1 %1375  ;;  %v429_v1 = vpack.c.bf16 %v425_v58, %v425_v58  ;;  %v365_v2 = vpack.c.bf16 %v361_v59, %v361_v59 }
  0x8a   :  { %1289 = vmatprep.subr.msk.bf16.mxu0 %vm76_vm2, %v303_v35  ;;  %v1373_v60 = vunpack.i.h.bf16 %v1371_v57  ;;  %v1372_v61 = vunpack.i.l.bf16 %v1371_v57  ;;  %v424_v4 = vsel %vm423_vm7, %v1367_v50, %v1368_v49  ;;  %v1378_v5 = vunpack.i.h.bf16 %v1376_v62 }
  0x8b   :  { %1281 = vmatmul.mubr.msk.bf16.vlgmr.msra.gmra.mrb[0].mxu1 %vm72_vm3, %v58_v52  ;;  %v1377_v6 = vunpack.i.l.bf16 %v1376_v62  ;;  %v371_v9 = vsel %vm76_vm2, %v365_v2, 0  ;;  %v428_v13 = vpack.c.bf16 %v424_v4, %v424_v4 }
  0x8c   :  { %258 = vmatpush1.bf16.msra.mxu1 %v252_v54  ;;  %289 = vmatprep.mubr.bf16.mxu1 %v1449_v7  ;;  %v488_v3 = vsel %vm486_vm8, %v1373_v60, %v1372_v61  ;;  %v487_v15 = vsel %vm486_vm8, %v1372_v61, %v1373_v60 }
  0x8d   :  { %1292 = vmatprep.subr.msk.bf16.mxu1 %vm76_vm2, %v366_v55  ;;  %v492_v10 = vpack.c.bf16 %v488_v3, %v488_v3  ;;  %v551_v14 = vsel %vm549_vm9, %v1378_v5, %v1377_v6  ;;  %v434_v17 = vsel %vm76_vm2, %v428_v13, 0  ;;  %v491_v19 = vpack.c.bf16 %v487_v15, %v487_v15 }
  0x8e   :  { %v555_v18 = vpack.c.bf16 %v551_v14, %v551_v14  ;;  %v550_v20 = vsel %vm549_vm9, %v1377_v6, %v1378_v5  ;;  %v37_v14 = vld [vmem:[%s1809_s1] sm:$0x3] }
  0x8f   :  { %1284 = vmatmul.mubr.msk.bf16.vlgmr.msra.gmra.mrb[4].mxu0 %vm72_vm3, %v1282_v63  ;;  %v497_v22 = vsel %vm76_vm2, %v491_v19, 0  ;;  %v554_v23 = vpack.c.bf16 %v550_v20, %v550_v20 }
  0x90   :  { %314 = vmatpush1.bf16.msra.mxu0 %v308_v0  ;;  %345 = vmatprep.mubr.bf16.mxu0 %v1449_v7 }
  0x91   :  { %1295 = vmatprep.subr.msk.bf16.mxu0 %vm76_vm2, %v429_v1  ;;  %v560_v25 = vsel %vm76_vm2, %v554_v23, 0  ;;  %v619_v1 = vshrl.u32 %v53_v11, 7 }
  0x93   :  { %1287 = vmatmul.mubr.msk.bf16.vlgmr.msra.gmra.mrb[4].mxu1 %vm72_vm3, %v1285_v8  ;;  %v624_v15 = vsub.s32 1, %v619_v1 }
  0x94   :  { %377 = vmatpush1.bf16.msra.mxu1 %v371_v9  ;;  %408 = vmatprep.mubr.bf16.mxu1 %v1449_v7  ;;  %v620_v9 = vsub.s32 0, %v619_v1 }
  0x95   :  { %1298 = vmatprep.subr.msk.bf16.mxu1 %vm76_vm2, %v492_v10  ;;  %v1665_v23 = vrot.slane %v37_v14, %v624_v15 }
  0x96   :  { %v1663_v11 = vrot.slane %v37_v14, %v620_v9 }
  0x97   :  { %1290 = vmatmul.mubr.msk.bf16.vlgmr.msra.gmra.mrb[8].mxu0 %vm72_vm3, %v1288_v16 }
  0x98   :  { %440 = vmatpush1.bf16.msra.mxu0 %v434_v17  ;;  %471 = vmatprep.mubr.bf16.mxu0 %v1449_v7 }
  0x99   :  { %1301 = vmatprep.subr.msk.bf16.mxu0 %vm76_vm2, %v555_v18 }
  0x9a   :  { %v611_v18 = vpop.permute.xlu0 %610 }
  0x9b   :  { %1293 = vmatmul.mubr.msk.bf16.vlgmr.msra.gmra.mrb[8].mxu1 %vm72_vm3, %v1291_v21 }
  0x9c   :  { %503 = vmatpush1.bf16.msra.mxu1 %v497_v22  ;;  %534 = vmatprep.mubr.bf16.mxu1 %v1449_v7 }
  0x9f   :  { %1296 = vmatmul.mubr.msk.bf16.vlgmr.msra.gmra.mrb[12].mxu0 %vm72_vm3, %v1294_v24 }
  0xa0   :  { %566 = vmatpush1.bf16.msra.mxu0 %v560_v25  ;;  %597 = vmatprep.mubr.bf16.mxu0 %v1449_v7 }
  0xa3   :  { %1299 = vmatmul.mubr.msk.bf16.vlgmr.msra.gmra.mrb[12].mxu1 %vm72_vm3, %v1297_v26 }
  0xa4   :  { %728 = vmatprep.mubr.bf16.mxu1 %v1449_v7 }
  0xa7   :  { %1302 = vmatmul.mubr.msk.bf16.vlgmr.msra.gmra.mrb[16].mxu0 %vm72_vm3, %v1300_v27 }
  0xa8   :  { %778 = vmatprep.mubr.bf16.mxu0 %v1449_v7 }
 0x15a   :  { %v117_v28 = vpop.f32.mrb[0].mxu0 }
 0x15b   :  { %v119_v29 = vpop.f32.mrb[1].mxu0 }
 0x15c   :  { %v121_v30 = vpop.f32.mrb[2].mxu0 }
 0x15d   :  { %v122_v31 = vpop.f32.mrb[3].mxu0 }
 0x15e   :  { %v167_v32 = vpop.f32.mrb[0].mxu1 }
 0x15f   :  { %v168_v33 = vadd.f32 %v167_v32, %v117_v28  ;;  %v169_v34 = vpop.f32.mrb[1].mxu1 }
 0x160   :  { %v170_v35 = vadd.f32 %v169_v34, %v119_v29  ;;  %v171_v36 = vpop.f32.mrb[2].mxu1 }
 0x161   :  { %v172_v37 = vpop.f32.mrb[3].mxu1 }
 0x162   :  { %v228_v38 = vpop.f32.mrb[4].mxu0 }
 0x163   :  { %v235_v39 = vadd.f32 %v228_v38, %v168_v33  ;;  %v230_v40 = vpop.f32.mrb[5].mxu0  ;;  %v616_v33 = vld [vmem:[%s1813_s5] sm:$0xff] }
 0x164   :  { %v236_v41 = vadd.f32 %v230_v40, %v170_v35  ;;  %v232_v42 = vpop.f32.mrb[6].mxu0 }
 0x165   :  { %v233_v43 = vpop.f32.mrb[7].mxu0 }
 0x166   :  { %v291_v44 = vpop.f32.mrb[4].mxu1 }
 0x167   :  { %v298_v45 = vadd.f32 %v291_v44, %v235_v39  ;;  %v293_v46 = vpop.f32.mrb[5].mxu1 }
 0x168   :  { %v299_v47 = vadd.f32 %v293_v46, %v236_v41  ;;  %v295_v48 = vpop.f32.mrb[6].mxu1  ;;  %v615_v41 = vld [vmem:[%s1812_s4] sm:$0xff] }
 0x169   :  { %v296_v49 = vpop.f32.mrb[7].mxu1 }
 0x16a   :  { %v347_v50 = vpop.f32.mrb[8].mxu0 }
 0x16b   :  { %v354_v51 = vadd.f32 %v347_v50, %v298_v45  ;;  %v349_v52 = vpop.f32.mrb[9].mxu0 }
 0x16c   :  { %v355_v53 = vadd.f32 %v349_v52, %v299_v47  ;;  %v351_v54 = vpop.f32.mrb[10].mxu0 }
 0x16d   :  { %v352_v55 = vpop.f32.mrb[11].mxu0 }
 0x16e   :  { %v410_v56 = vpop.f32.mrb[8].mxu1 }
 0x16f   :  { %v417_v57 = vadd.f32 %v410_v56, %v354_v51  ;;  %v412_v58 = vpop.f32.mrb[9].mxu1 }
 0x170   :  { %v418_v59 = vadd.f32 %v412_v58, %v355_v53  ;;  %v414_v60 = vpop.f32.mrb[10].mxu1 }
 0x171   :  { %v415_v61 = vpop.f32.mrb[11].mxu1 }
 0x172   :  { %v473_v62 = vpop.f32.mrb[12].mxu0 }
 0x173   :  { %v480_v63 = vadd.f32 %v473_v62, %v417_v57  ;;  %v475_v0 = vpop.f32.mrb[13].mxu0  ;;  %v665_v57 = vld [vmem:[%s1815_s7] sm:$0xff] }
 0x174   :  { %v481_v2 = vadd.f32 %v475_v0, %v418_v59  ;;  %v477_v3 = vpop.f32.mrb[14].mxu0 }
 0x175   :  { %v478_v4 = vpop.f32.mrb[15].mxu0 }
 0x176   :  { %v536_v5 = vpop.f32.mrb[12].mxu1 }
 0x177   :  { %v543_v6 = vadd.f32 %v536_v5, %v480_v63  ;;  %v538_v8 = vpop.f32.mrb[13].mxu1 }
 0x178   :  { %v544_v10 = vadd.f32 %v538_v8, %v481_v2  ;;  %v540_v13 = vpop.f32.mrb[14].mxu1 }
 0x179   :  { %v541_v16 = vpop.f32.mrb[15].mxu1 }
 0x17a   :  { %v599_v17 = vpop.f32.mrb[16].mxu0 }
 0x17b   :  { %v606_v19 = vadd.f32 %v599_v17, %v543_v6  ;;  %v601_v20 = vpop.f32.mrb[17].mxu0 }
 0x17c   :  { %v607_v21 = vadd.f32 %v601_v20, %v544_v10  ;;  %v603_v22 = vpop.f32.mrb[18].mxu0 }
 0x17d   :  { %v613_v24 = vadd.f32 %v611_v18, %v606_v19  ;;  %v604_v25 = vpop.f32.mrb[19].mxu0  ;;  %v1303_v19 = vld [vmem:[%s1814_s6 + $0x4] sm:$0xf] }
 0x17e   :  { %v614_v26 = vadd.f32 %v611_v18, %v607_v21 }
 0x17f   :  { %v628_v27 = vmul.f32 %v1663_v11, %v613_v24 }
 0x180   :  { %v629_v28 = vmul.f32 %v1665_v23, %v614_v26 }
 0x181   :  { %v633_v29 = vmul.f32 %v628_v27, %v628_v27 }
 0x182   :  { %v630_v30 = vadd.f32 %v629_v28, %v628_v27  ;;  %v634_v31 = vmul.f32 %v629_v28, %v629_v28 }
 0x184   :  { %631 = vadd.xlane.f32.xlu1 %v630_v30  ;;  %v635_v32 = vadd.f32 %v634_v31, %v633_v29 }
 0x186   :  { %636 = vadd.xlane.f32.xlu0 %v635_v32  ;;  %v672_v32 = vld [vmem:[%s1814_s6] sm:$0xf] }
 0x19c   :  { %656 = vperm.xlu0 %1379, %v616_v33  }
 0x211   :  { %v632_v34 = vpop.xlane.xlu1 %631 }
 0x212   :  { %v638_v35 = vmul.f32 0.0078125, %v632_v34 }
 0x213   :  { %v637_v36 = vpop.xlane.xlu0 %636 }
 0x214   :  { %v639_v37 = vmul.f32 0.0078125, %v637_v36  ;;  %v640_v38 = vmul.f32 %v638_v35, %v638_v35  ;;  %v642_v44 = vsub.f32 %v613_v24, %v638_v35  ;;  %v643_v45 = vsub.f32 %v614_v26, %v638_v35 }
 0x216   :  { %v641_v39 = vsub.f32 %v639_v37, %v640_v38 }
 0x218   :  { %v644_v40 = vadd.f32 1e-05, %v641_v39 }
 0x21a   :  { %1421 = vrsqrt.f32 %v644_v40 }
 0x21b   :  { %v657_v49 = vpop.permute.xlu0 %656 }
 0x224   :  { %v1422_v42 = vpop.eup %1421 }
 0x225   :  { %v646_v43 = vmul.f32 %v1422_v42, %v615_v41 }
 0x227   :  { %649 = vperm.xlu1 %1380, %v646_v43  }
 0x2a6   :  { %v650_v46 = vpop.permute.xlu1 %649 }
 0x2a7   :  { %v652_v47 = vmul.f32 %v650_v46, %v642_v44  ;;  %v653_v48 = vmul.f32 %v650_v46, %v643_v45  ;;  %v1308_v46 = vld [vmem:[%s1814_s6 + $0x8] sm:$0xf] }
 0x2a9   :  { %v659_v50 = vadd.f32 %v657_v49, %v652_v47  ;;  %v660_v51 = vadd.f32 %v657_v49, %v653_v48 }
 0x2ab   :  { %v661_v52 = vmax.f32 %v659_v50, 0.0  ;;  %v662_v53 = vmax.f32 %v660_v51, 0.0 }
 0x2ad   :  { %v1676_v54 = vmul.f32 %v661_v52, %v1663_v11  ;;  %v664_v55 = vmul.f32 %v662_v53, %v1665_v23 }
 0x2af   :  { %v1391_v56 = vpack.i.bf16 %v664_v55, %v1676_v54  ;;  %v914_v29 = vpack.c.bf16 %v664_v55, %v664_v55  ;;  %v913_v42 = vpack.c.bf16 %v1676_v54, %v1676_v54  ;;  %v1311_v55 = vld [vmem:[%s1814_s6 + $0xc] sm:$0xf] }
 0x2b1   :  { %1392 = vrot.lane.b32.xlu0 %v1391_v56, %s1451_s21  ;;  %1382 = vrot.lane.b32.xlu1 %v1391_v56, %s1450_s0  ;;  %v919_v50 = vsel %vm689_vm10, %v913_v42, 0 }
 0x2b5   :  { %1402 = vrot.lane.b32.xlu0 %v1391_v56, %s1454_s24  ;;  %1387 = vrot.lane.b32.xlu1 %v1391_v56, %s1452_s22 }
 0x2b9   :  { %1412 = vrot.lane.b32.xlu0 %v1391_v56, %s1456_s26  ;;  %1397 = vrot.lane.b32.xlu1 %v1391_v56, %s1453_s23 }
 0x2bd   :  { %1217 = vperm.xlu0 %1379, %v665_v57   ;;  %1407 = vrot.lane.b32.xlu1 %v1391_v56, %s1455_s25 }
 0x2c1   :  { %1417 = vrot.lane.b32.xlu1 %v1391_v56, %s1457_s27 }
 0x323   :  { %v1393_v58 = vpop.permute.xlu0 %1392  ;;  %v1383_v59 = vpop.permute.xlu1 %1382 }
 0x324   :  { %v1395_v60 = vunpack.i.h.bf16 %v1393_v58  ;;  %v1394_v61 = vunpack.i.l.bf16 %v1393_v58  ;;  %v1385_v62 = vunpack.i.h.bf16 %v1383_v59  ;;  %v1384_v63 = vunpack.i.l.bf16 %v1383_v59 }
 0x326   :  { %v791_v0 = vsel %vm178_vm1, %v1394_v61, %v1395_v60  ;;  %v679_v1 = vsel %vm65_vm0, %v1384_v63, %v1385_v62  ;;  %v680_v2 = vsel %vm65_vm0, %v1385_v62, %v1384_v63  ;;  %v792_v3 = vsel %vm178_vm1, %v1395_v60, %v1394_v61  ;;  %v1314_v61 = vld [vmem:[%s1814_s6 + $0x10] sm:$0xf] }
 0x327   :  { %v684_v4 = vpack.c.bf16 %v679_v1, %v679_v1  ;;  %v1403_v5 = vpop.permute.xlu0 %1402  ;;  %v1388_v6 = vpop.permute.xlu1 %1387  ;;  %v683_v8 = vpack.c.bf16 %v680_v2, %v680_v2  ;;  %v796_v13 = vpack.c.bf16 %v791_v0, %v791_v0  ;;  %v795_v15 = vpack.c.bf16 %v792_v3, %v792_v3  ;;  %v1317_v2 = vld [vmem:[%s1814_s6 + $0x14] sm:$0xf] }
 0x328   :  { %v1390_v9 = vunpack.i.h.bf16 %v1388_v6  ;;  %v1389_v10 = vunpack.i.l.bf16 %v1388_v6  ;;  %v1405_v16 = vunpack.i.h.bf16 %v1403_v5  ;;  %v1404_v17 = vunpack.i.l.bf16 %v1403_v5  ;;  %v1320_v6 = vld [vmem:[%s1814_s6 + $0x18] sm:$0xf] }
 0x329   :  { %1304 = vmatprep.subr.msk.bf16.mxu1 %vm689_vm10, %v684_v4  ;;  %v691_v14 = vsel %vm689_vm10, %v683_v8, 0  ;;  %v801_v28 = vsel %vm689_vm10, %v795_v15, 0 }
 0x32a   :  { %v670_v18 = vsel %vm55_vm4, %v1389_v10, %v1390_v9  ;;  %697 = vmatpush1.bf16.msra.mxu1 %v691_v14  ;;  %v671_v20 = vsel %vm55_vm4, %v1390_v9, %v1389_v10  ;;  %v972_v30 = vsel %vm360_vm6, %v1405_v16, %v1404_v17  ;;  %v971_v47 = vsel %vm360_vm6, %v1404_v17, %v1405_v16  ;;  %v1326_v9 = vld [vmem:[%s1814_s6 + $0x20] sm:$0xf] }
 0x32b   :  { %v674_v21 = vpack.c.bf16 %v670_v18, %v670_v18  ;;  %v1398_v22 = vpop.permute.xlu1 %1397  ;;  %1309 = vmatprep.subr.msk.bf16.mxu1 %vm689_vm10, %v796_v13  ;;  %v673_v24 = vpack.c.bf16 %v671_v20, %v671_v20  ;;  %v1413_v34 = vpop.permute.xlu0 %1412  ;;  %v976_v40 = vpack.c.bf16 %v972_v30, %v972_v30  ;;  %v975_v51 = vpack.c.bf16 %v971_v47, %v971_v47 }
 0x32c   :  { %v1400_v25 = vunpack.i.h.bf16 %v1398_v22  ;;  %v1399_v26 = vunpack.i.l.bf16 %v1398_v22  ;;  %v1415_v43 = vunpack.i.h.bf16 %v1413_v34  ;;  %v1414_v44 = vunpack.i.l.bf16 %v1413_v34 }
 0x32d   :  { %1305 = vmatmul.mubr.msk.bf16.vlgmr.msra.gmra.mrb[16].mxu1 %vm685_vm11, %v1303_v19  ;;  %1306 = vmatprep.subr.msk.bf16.mxu0 %vm689_vm10, %v674_v21  ;;  %v741_v27 = vsel %vm689_vm10, %v673_v24, 0  ;;  %v981_v58 = vsel %vm689_vm10, %v975_v51, 0 }
 0x32e   :  { %v853_v31 = vsel %vm241_vm5, %v1399_v26, %v1400_v25  ;;  %747 = vmatpush1.bf16.msra.mxu0 %v741_v27  ;;  %807 = vmatpush1.bf16.msra.mxu1 %v801_v28  ;;  %v854_v33 = vsel %vm241_vm5, %v1400_v25, %v1399_v26  ;;  %v1096_v52 = vsel %vm486_vm8, %v1415_v43, %v1414_v44 }
 0x32f   :  { %v858_v35 = vpack.c.bf16 %v853_v31, %v853_v31  ;;  %v1408_v36 = vpop.permute.xlu1 %1407  ;;  %1315 = vmatprep.subr.msk.bf16.mxu1 %vm689_vm10, %v914_v29  ;;  %v857_v37 = vpack.c.bf16 %v854_v33, %v854_v33  ;;  %838 = vmatprep.mubr.bf16.mxu1 %v1449_v7  ;;  %v1100_v57 = vpack.c.bf16 %v1096_v52, %v1096_v52 }
 0x330   :  { %v1410_v38 = vunpack.i.h.bf16 %v1408_v36  ;;  %v1409_v39 = vunpack.i.l.bf16 %v1408_v36  ;;  %v1095_v62 = vsel %vm486_vm8, %v1414_v44, %v1415_v43 }
 0x331   :  { %1307 = vmatmul.mubr.msk.bf16.vlgmr.msra.gmra.mrb[20].mxu0 %vm685_vm11, %v672_v32  ;;  %1312 = vmatprep.subr.msk.bf16.mxu0 %vm689_vm10, %v858_v35  ;;  %v863_v41 = vsel %vm689_vm10, %v857_v37, 0  ;;  %v1099_v1 = vpack.c.bf16 %v1095_v62, %v1095_v62 }
 0x332   :  { %v1034_v45 = vsel %vm423_vm7, %v1410_v38, %v1409_v39  ;;  %869 = vmatpush1.bf16.msra.mxu0 %v863_v41  ;;  %900 = vmatprep.mubr.bf16.mxu0 %v1449_v7  ;;  %v1033_v56 = vsel %vm423_vm7, %v1409_v39, %v1410_v38 }
 0x333   :  { %v1038_v48 = vpack.c.bf16 %v1034_v45, %v1034_v45  ;;  %v1418_v49 = vpop.permute.xlu1 %1417  ;;  %1318 = vmatprep.subr.msk.bf16.mxu0 %vm689_vm10, %v976_v40  ;;  %v1037_v59 = vpack.c.bf16 %v1033_v56, %v1033_v56  ;;  %v1105_v4 = vsel %vm689_vm10, %v1099_v1, 0 }
 0x334   :  { %v1420_v53 = vunpack.i.h.bf16 %v1418_v49  ;;  %v1419_v54 = vunpack.i.l.bf16 %v1418_v49 }
 0x335   :  { %1310 = vmatmul.mubr.msk.bf16.vlgmr.msra.gmra.mrb[20].mxu1 %vm685_vm11, %v1308_v46  ;;  %v1043_v0 = vsel %vm689_vm10, %v1037_v59, 0 }
 0x336   :  { %925 = vmatpush1.bf16.msra.mxu1 %v919_v50  ;;  %956 = vmatprep.mubr.bf16.mxu1 %v1449_v7  ;;  %v1158_v60 = vsel %vm549_vm9, %v1420_v53, %v1419_v54  ;;  %v1157_v3 = vsel %vm549_vm9, %v1419_v54, %v1420_v53 }
 0x337   :  { %1321 = vmatprep.subr.msk.bf16.mxu1 %vm689_vm10, %v1038_v48  ;;  %v1162_v63 = vpack.c.bf16 %v1158_v60, %v1158_v60  ;;  %v1161_v5 = vpack.c.bf16 %v1157_v3, %v1157_v3 }
 0x339   :  { %1313 = vmatmul.mubr.msk.bf16.vlgmr.msra.gmra.mrb[24].mxu0 %vm685_vm11, %v1311_v55  ;;  %v1167_v8 = vsel %vm689_vm10, %v1161_v5, 0 }
 0x33a   :  { %987 = vmatpush1.bf16.msra.mxu0 %v981_v58  ;;  %1018 = vmatprep.mubr.bf16.mxu0 %v1449_v7 }
 0x33b   :  { %1324 = vmatprep.subr.msk.bf16.mxu0 %vm689_vm10, %v1100_v57 }
 0x33d   :  { %1316 = vmatmul.mubr.msk.bf16.vlgmr.msra.gmra.mrb[24].mxu1 %vm685_vm11, %v1314_v61  ;;  %v1218_v61 = vpop.permute.xlu0 %1217 }
 0x33e   :  { %1049 = vmatpush1.bf16.msra.mxu1 %v1043_v0  ;;  %1080 = vmatprep.mubr.bf16.mxu1 %v1449_v7 }
 0x33f   :  { %1327 = vmatprep.subr.msk.bf16.mxu1 %vm689_vm10, %v1162_v63 }
 0x341   :  { %1319 = vmatmul.mubr.msk.bf16.vlgmr.msra.gmra.mrb[28].mxu0 %vm685_vm11, %v1317_v2 }
 0x342   :  { %1111 = vmatpush1.bf16.msra.mxu0 %v1105_v4  ;;  %1142 = vmatprep.mubr.bf16.mxu0 %v1449_v7 }
 0x345   :  { %1322 = vmatmul.mubr.msk.bf16.vlgmr.msra.gmra.mrb[28].mxu1 %vm685_vm11, %v1320_v6 }
 0x346   :  { %1173 = vmatpush1.bf16.msra.mxu1 %v1167_v8  ;;  %1204 = vmatprep.mubr.bf16.mxu1 %v1449_v7 }
 0x349   :  { %1325 = vmatmul.mubr.msk.bf16.vlgmr.msra.gmra.mrb[32].mxu0 %vm685_vm11, %v1323_v12 }
 0x34d   :  { %1328 = vmatmul.mubr.msk.bf16.vlgmr.msra.gmra.mrb[32].mxu1 %vm685_vm11, %v1326_v9  ;;  %v1223_v9 = vld [vmem:[%s1817_s9] sm:$0xff]  ;;  %s1458_s9 = smov [#allocation2]  }
 0x34e   :  { %s1269_s1 = sshll.u32 %s1458_s9, 4  ;;  %s1270_s1 = int_to_ptr.vmem [resolvable:$true] %s1269_s1 }
 0x34f   :  { %p1430_p1 = scmp.lt.s32.totalorder %s1270_s1, %s1270_s1 }
 0x400   :  { %v730_v10 = vpop.f32.mrb[16].mxu1 }
 0x401   :  { %v732_v13 = vpop.f32.mrb[17].mxu1 }
 0x402   :  { %v734_v14 = vpop.f32.mrb[18].mxu1 }
 0x403   :  { %v735_v15 = vpop.f32.mrb[19].mxu1 }
 0x404   :  { %v780_v16 = vpop.f32.mrb[20].mxu0 }
 0x405   :  { %v781_v17 = vadd.f32 %v780_v16, %v730_v10  ;;  %v782_v18 = vpop.f32.mrb[21].mxu0 }
 0x406   :  { %v783_v19 = vadd.f32 %v782_v18, %v732_v13  ;;  %v784_v20 = vpop.f32.mrb[22].mxu0 }
 0x407   :  { %v785_v21 = vpop.f32.mrb[23].mxu0 }
 0x408   :  { %v840_v22 = vpop.f32.mrb[20].mxu1 }
 0x409   :  { %v847_v7 = vadd.f32 %v840_v22, %v781_v17  ;;  %v842_v24 = vpop.f32.mrb[21].mxu1 }
 0x40a   :  { %v848_v25 = vadd.f32 %v842_v24, %v783_v19  ;;  %v844_v26 = vpop.f32.mrb[22].mxu1  ;;  %v1222_v19 = vld [vmem:[%s1816_s8] sm:$0xff]  ;;  %s1425_s8 = scalar_lea.vmem %s1270_s1, 256 }
 0x40b   :  { %v845_v27 = vpop.f32.mrb[23].mxu1  ;;  %p1426_p0 = scmp.ne.s32.totalorder %s1270_s1, %s1425_s8  ;;  %p1431_p2 = scmp.lt.s32.totalorder %s1425_s8, %s1425_s8 }
 0x40c   :  { %v902_v28 = vpop.f32.mrb[24].mxu0 }
 0x40d   :  { %v909_v29 = vadd.f32 %v902_v28, %v847_v7  ;;  %v904_v30 = vpop.f32.mrb[25].mxu0  ;;  %p1432_p3 = por %p1431_p2, %p1430_p1 }
 0x40e   :  { %v910_v31 = vadd.f32 %v904_v30, %v848_v25  ;;  %v906_v32 = vpop.f32.mrb[26].mxu0 }
 0x40f   :  { %v907_v33 = vpop.f32.mrb[27].mxu0  ;;  %p1433_p4 = pnand %p1432_p3, %p1426_p0 }
 0x410   :  { %v958_v34 = vpop.f32.mrb[24].mxu1 }
 0x411   :  { %v965_v35 = vadd.f32 %v958_v34, %v909_v29  ;;  %v960_v36 = vpop.f32.mrb[25].mxu1 }
 0x412   :  { %v966_v37 = vadd.f32 %v960_v36, %v910_v31  ;;  %v962_v38 = vpop.f32.mrb[26].mxu1 }
 0x413   :  { %v963_v39 = vpop.f32.mrb[27].mxu1 }
 0x414   :  { %v1020_v40 = vpop.f32.mrb[28].mxu0 }
 0x415   :  { %v1027_v41 = vadd.f32 %v1020_v40, %v965_v35  ;;  %v1022_v42 = vpop.f32.mrb[29].mxu0 }
 0x416   :  { %v1028_v43 = vadd.f32 %v1022_v42, %v966_v37  ;;  %v1024_v44 = vpop.f32.mrb[30].mxu0 }
 0x417   :  { %v1025_v45 = vpop.f32.mrb[31].mxu0 }
 0x418   :  { %v1082_v46 = vpop.f32.mrb[28].mxu1 }
 0x419   :  { %v1089_v47 = vadd.f32 %v1082_v46, %v1027_v41  ;;  %v1084_v48 = vpop.f32.mrb[29].mxu1 }
 0x41a   :  { %v1090_v49 = vadd.f32 %v1084_v48, %v1028_v43  ;;  %v1086_v50 = vpop.f32.mrb[30].mxu1 }
 0x41b   :  { %v1087_v51 = vpop.f32.mrb[31].mxu1 }
 0x41c   :  { %v1144_v52 = vpop.f32.mrb[32].mxu0 }
 0x41d   :  { %v1151_v53 = vadd.f32 %v1144_v52, %v1089_v47  ;;  %v1146_v54 = vpop.f32.mrb[33].mxu0 }
 0x41e   :  { %v1152_v55 = vadd.f32 %v1146_v54, %v1090_v49  ;;  %v1148_v56 = vpop.f32.mrb[34].mxu0 }
 0x41f   :  { %v1149_v57 = vpop.f32.mrb[35].mxu0 }
 0x420   :  { %v1206_v58 = vpop.f32.mrb[32].mxu1 }
 0x421   :  { %v1213_v59 = vadd.f32 %v1206_v58, %v1151_v53  ;;  %v1208_v60 = vpop.f32.mrb[33].mxu1 }
 0x422   :  { %v1214_v62 = vadd.f32 %v1208_v60, %v1152_v55  ;;  %v1210_v63 = vpop.f32.mrb[34].mxu1 }
 0x423   :  { %v1220_v0 = vadd.f32 %v1218_v61, %v1213_v59  ;;  %v1211_v1 = vpop.f32.mrb[35].mxu1 }
 0x424   :  { %v1221_v2 = vadd.f32 %v1218_v61, %v1214_v62 }
 0x425   :  { %v1224_v3 = vmul.f32 %v1220_v0, %v1663_v11 }
 0x426   :  { %v1225_v4 = vmul.f32 %v1221_v2, %v1665_v23 }
 0x427   :  { %v1229_v5 = vmul.f32 %v1224_v3, %v1224_v3 }
 0x428   :  { %v1226_v6 = vadd.f32 %v1225_v4, %v1224_v3  ;;  %v1230_v8 = vmul.f32 %v1225_v4, %v1225_v4 }
 0x42a   :  { %1227 = vadd.xlane.f32.xlu1 %v1226_v6  ;;  %v1231_v12 = vadd.f32 %v1230_v8, %v1229_v5 }
 0x42c   :  { %1232 = vadd.xlane.f32.xlu0 %v1231_v12 }
 0x43b   :  { %1252 = vperm.xlu1 %1380, %v1223_v9  }
 0x4b7   :  { %v1228_v10 = vpop.xlane.xlu1 %1227 }
 0x4b8   :  { %v1234_v13 = vmul.f32 0.0078125, %v1228_v10 }
 0x4b9   :  { %v1233_v14 = vpop.xlane.xlu0 %1232 }
 0x4ba   :  { %v1235_v15 = vmul.f32 0.0078125, %v1233_v14  ;;  %v1236_v16 = vmul.f32 %v1234_v13, %v1234_v13  ;;  %v1238_v22 = vsub.f32 %v1220_v0, %v1234_v13  ;;  %v1239_v7 = vsub.f32 %v1221_v2, %v1234_v13 }
 0x4bb   :  { %v1253_v27 = vpop.permute.xlu1 %1252 }
 0x4bc   :  { %v1237_v17 = vsub.f32 %v1235_v15, %v1236_v16 }
 0x4be   :  { %v1240_v18 = vadd.f32 1e-05, %v1237_v17 }
 0x4c0   :  { %1423 = vrsqrt.f32 %v1240_v18 }
 0x4ca   :  { %v1424_v20 = vpop.eup %1423 }
 0x4cb   :  { %v1242_v21 = vmul.f32 %v1424_v20, %v1222_v19 }
 0x4cd   :  { %1245 = vperm.xlu0 %1379, %v1242_v21  }
 0x54c   :  { %v1246_v24 = vpop.permute.xlu0 %1245 }
 0x54d   :  { %v1248_v25 = vmul.f32 %v1246_v24, %v1238_v22  ;;  %v1249_v26 = vmul.f32 %v1246_v24, %v1239_v7 }
 0x54f   :  { %v1255_v28 = vadd.f32 %v1253_v27, %v1248_v25  ;;  %v1256_v29 = vadd.f32 %v1253_v27, %v1249_v26 }
 0x551   :  { %v1257_v30 = vmax.f32 %v1255_v28, 0.0  ;;  %v1258_v31 = vmax.f32 %v1256_v29, 0.0 }
 0x553   :  { %v1259_v32 = vmul.f32 %v1257_v30, %v1663_v11  ;;  %v1260_v33 = vmul.f32 %v1258_v31, %v1665_v23 }
 0x555   :  { %1261 = vst [vmem:[#allocation2] sm:$0xff] %v1259_v32  ;;  %1262 = vst [vmem:[#allocation2 + $0x8] sm:$0xff] %v1260_v33 }
 0x556   :  { %1436 = shalt.err (!%p1433_p4)
}
 0x557   :  { %s1437_s16 = scalar_lea.hbm %s1818_s10, 256 }
 0x558   :  { %p1438_p5 = scmp.ne.s32.totalorder %s1818_s10, %s1437_s16  ;;  %p1441_p6 = scmp.lt.u32.totalorder %s1437_s16, %s1818_s10 }
 0x55a   :  { %p1443_p7 = pnand %p1441_p6, %p1438_p5 }
 0x55c   :  { %1446 = shalt.err (!%p1443_p7)
}
 0x55d   :  { %1272 = dma.vmem_to_hbm [thread:$0]  %s1270_s1, 256, %s1818_s10, [#allocation3]  }
 0x55e   :  { %1447 = dma.done.wait [#allocation3], 256  }
 0x55f   :  { %1448 = vsyncadd [#allocation3], 4294967040 }
 0x560   :  { %1276 = vsyncpa [#allocation3], 1 }

</bundles_post_ra>
